<compile_context>
chip_gen: v6e
topology: v6e:2x2x1
jax: 0.10.0
libtpu: 0.0.40
codegen_flags: <defaults>
</compile_context>

<pallas_src>
import numpy as np
import jax
import jax.numpy as jnp
from jax import lax
from jax.experimental import pallas as pl
from jax.experimental.pallas import tpu as pltpu

# ---------------- module hyper-parameters (mirrors nn.Module __init__) -------
GI_DIM = 32                # per-span representation dim g_i
DIST_DIM = 20              # phi_distance(distance_dim=20)
GENRE_DIM = 20             # Genre(genre_dim=20)
SPK_DIM = 20               # Speaker(speaker_dim=20)
PHI_DIM = DIST_DIM + GENRE_DIM + SPK_DIM
GIJ_DIM = 3 * GI_DIM + PHI_DIM     # = 156, input dim of the pairwise mlp
HIDDEN = 150               # mlp hidden_dim default

GENRES = ['bc', 'bn', 'mz', 'nw', 'pt', 'tc', 'wb']
G_TO_I = {g: i + 1 for i, g in enumerate(GENRES)}
DIST_BINS = [1, 2, 3, 4, 5, 8, 16, 32, 64]


# ---------------------------- Pallas kernel ----------------------------------
def pairwise_score_kernel(x_ref, ssum_ref,
                          w1_ref, b1_ref, w2_ref, b2_ref, w3_ref,
                          out_ref):
    # x = [i_g | j_g | i_g*j_g | phi], prebuilt in the wrapper: (TP, 156) bf16
    x = x_ref[...]

    h1 = jnp.dot(x, w1_ref[...], preferred_element_type=jnp.float32) + b1_ref[...]
    h1 = jnp.maximum(h1, 0.0).astype(jnp.bfloat16)

    h2 = jnp.dot(h1, w2_ref[...], preferred_element_type=jnp.float32) + b2_ref[...]
    h2 = jnp.maximum(h2, 0.0).astype(jnp.bfloat16)

    # Final layer lane-dense: (1, H) x (TP, H) contracting H -> (1, TP)
    score = lax.dot_general(w3_ref[...], h2,
                            dimension_numbers=(((1,), (1,)), ((), ())),
                            preferred_element_type=jnp.float32)    # (1, TP)

    # coref_scores = s_i + s_j + b3 + pairwise_score
    # (s_i + s_j + b3 prefolded in the wrapper as one lane-dense row)
    out_ref[...] = score + ssum_ref[...]


def _choose_tile(P):
    """Single big pair tile (128-aligned, capped at 2048).

    Per pair the MLP is ~92 kFLOP, so even a 512-pair tile is far cheaper than
    the ~600-cycle per-grid-step overhead: the kernel is step-overhead-bound,
    not compute- or VMEM-bound (a 2048x156 bf16 tile is <1 MB double-buffered).
    """
    tp = int(pl.cdiv(max(P, 1), 128)) * 128
    return min(tp, 2048)


def pairwise_scores_pallas(pairs, ssum_plus_b3, params):
    """Run the pairwise-score MLP kernel over P pairs (padded to a tile mult).

    pairs:        (P, GIJ_DIM) float32  — [i_g | j_g | i_g*j_g | phi]
    ssum_plus_b3: (P,)        float32  — s_i + s_j + b3
    """
    P = pairs.shape[0]
    if P == 0:
        return jnp.zeros((0, 1), jnp.float32)

    tp = _choose_tile(P)
    P_pad = int(pl.cdiv(P, tp)) * tp
    n_tiles = P_pad // tp

    pairs_p = jnp.pad(pairs, ((0, P_pad - P), (0, 0))).astype(jnp.bfloat16)
    ssum_row = jnp.pad(ssum_plus_b3, (0, P_pad - P)).reshape(1, P_pad)

    full_spec = lambda shp: pl.BlockSpec(shp, lambda i: (0, 0))

    grid_spec = pltpu.PrefetchScalarGridSpec(
        num_scalar_prefetch=0,
        grid=(n_tiles,),
        in_specs=[
            pl.BlockSpec((tp, GIJ_DIM), lambda i: (i, 0)),   # pairs (bf16)
            pl.BlockSpec((1, tp), lambda i: (0, i)),          # s_i+s_j+b3 row
            full_spec((GIJ_DIM, HIDDEN)),                     # W1 (fused, bf16)
            full_spec((1, HIDDEN)),                           # b1 (f32)
            full_spec((HIDDEN, HIDDEN)),                      # W2 (bf16)
            full_spec((1, HIDDEN)),                           # b2 (f32)
            full_spec((1, HIDDEN)),                           # W3 as a row (bf16)
        ],
        out_specs=pl.BlockSpec((1, tp), lambda i: (0, i)),
    )

    out = pl.pallas_call(
        pairwise_score_kernel,
        out_shape=jax.ShapeDtypeStruct((1, P_pad), jnp.float32),
        grid_spec=grid_spec,
        compiler_params=pltpu.CompilerParams(dimension_semantics=("parallel",)),
    )(pairs_p, ssum_row,
      params["w1"], params["b1"], params["w2"], params["b2"], params["w3_row"])

    return out[0, :P].reshape(P, 1)


# ---------------------------- module glue -------------------------------------
class Span:
    def __init__(self, sid, start, end, genre, speaker):
        self.id = sid
        self.start = start
        self.end = end
        self.genre = genre
        self.speaker = speaker
        self.yi = []
        self.yi_idx = None


def length_to_bin(num):
    # phi_distance.length_to_bin for a single length
    return sum(1 for b in DIST_BINS if num >= b)


def compare_span_speaker(s1, s2):
    return 1 if s1.speaker == s2.speaker else 2


def init_params(key):
    ks = jax.random.split(key, 12)
    scale = 0.05
    bf = jnp.bfloat16
    p = {
        # pairwise mlp: Linear(GIJ_DIM->H) stored fused + transposed (in, out),
        # then H->H and H->1 (W3 kept as a (1,H) row for the lane-dense output).
        "w1": (scale * jax.random.normal(ks[0], (GIJ_DIM, HIDDEN), jnp.float32)).astype(bf),
        "b1": scale * jax.random.normal(ks[4], (1, HIDDEN), jnp.float32),
        "w2": (scale * jax.random.normal(ks[5], (HIDDEN, HIDDEN), jnp.float32)).astype(bf),
        "b2": scale * jax.random.normal(ks[6], (1, HIDDEN), jnp.float32),
        "w3_row": (scale * jax.random.normal(ks[7], (1, HIDDEN), jnp.float32)).astype(bf),
        "b3": scale * jax.random.normal(ks[8], (1, 1), jnp.float32),
        # embedding tables (gather glue stays f32)
        "dist_emb": scale * jax.random.normal(ks[9], (len(DIST_BINS) + 1, DIST_DIM), jnp.float32),
        "genre_emb": (scale * jax.random.normal(ks[10], (len(GENRES) + 1, GENRE_DIM), jnp.float32)
                      ).at[0].set(0.0),   # padding_idx=0
        "spk_emb": (scale * jax.random.normal(ks[11], (3, SPK_DIM), jnp.float32)
                    ).at[0].set(0.0),     # padding_idx=0
    }
    return p


def _ragged_softmax_device(coref_scores, group_sizes):
    """Per-span softmax with epsilon slot + pad(69), done on device in JAX.

    group_sizes includes the leading empty group (mirrors torch.tensor([]) in
    the PyTorch forward).  Returns (n_groups, max_group+1) float32.
    """
    n_groups = len(group_sizes)
    max_len = max(group_sizes) + 1          # +1 epsilon slot per group

    idx = np.zeros((n_groups, max_len), np.int32)
    valid = np.zeros((n_groups, max_len), np.float32)
    eps_pos = np.zeros((n_groups,), np.int32)
    off = 0
    for k, g in enumerate(group_sizes):
        idx[k, :g] = np.arange(off, off + g)
        valid[k, :g + 1] = 1.0
        eps_pos[k] = g
        off += g

    scores_flat = coref_scores[:, 0]
    gathered = jnp.take(scores_flat, jnp.asarray(idx), axis=0)      # (G, L)
    is_eps = jnp.arange(max_len)[None, :] == jnp.asarray(eps_pos)[:, None]
    valid_j = jnp.asarray(valid) > 0

    x = jnp.where(is_eps, 0.0, gathered)                  # epsilon score = 0
    x = jnp.where(valid_j, x, -jnp.inf)                   # mask padding
    m = jnp.max(x, axis=1, keepdims=True)
    e = jnp.exp(x - m)
    p = e / jnp.sum(e, axis=1, keepdims=True)
    return jnp.where(valid_j, p, 69.0)                    # pad_sequence(69)


def pairwise_score_forward(spans, g_i, mention_scores, params):
    # --- build pair index lists (mirrors the Python loop in forward) ---------
    mention_ids, antecedent_ids, dist_bins, genre_ids, spk_ids = [], [], [], [], []
    for i in spans:
        for j in i.yi:
            mention_ids.append(i.id)
            antecedent_ids.append(j.id)
            dist_bins.append(length_to_bin(i.end - j.start))
            genre_ids.append(G_TO_I.get(i.genre, 0))
            spk_ids.append(compare_span_speaker(i, j))

    mention_ids = jnp.asarray(mention_ids, jnp.int32)
    antecedent_ids = jnp.asarray(antecedent_ids, jnp.int32)

    # --- embedding lookups (glue gathers; includes phi_distance embedding) ---
    phi = jnp.concatenate([
        params["dist_emb"][jnp.asarray(dist_bins, jnp.int32)],
        params["genre_emb"][jnp.asarray(genre_ids, jnp.int32)],
        params["spk_emb"][jnp.asarray(spk_ids, jnp.int32)],
    ], axis=1)

    i_g = jnp.take(g_i, mention_ids, axis=0)
    j_g = jnp.take(g_i, antecedent_ids, axis=0)

    # pairs = cat(i_g, j_g, i_g*j_g, phi) built ONCE here in f32 (fuses with
    # the gathers above); the kernel streams it as a single (tp, 156) block.
    pairs = jnp.concatenate([i_g, j_g, i_g * j_g, phi], axis=1)

    # s_i + s_j + b3 prefolded as one lane-dense row for the kernel.
    ssum_plus_b3 = (jnp.take(mention_scores[:, 0], mention_ids)
                    + jnp.take(mention_scores[:, 0], antecedent_ids)
                    + params["b3"][0, 0])

    # --- Pallas kernel: pairwise MLP + score sum ------------------------------
    coref_scores = pairwise_scores_pallas(pairs, ssum_plus_b3, params)

    # --- ragged per-span softmax with epsilon + pad(69), on device -----------
    for span in spans:
        span.yi_idx = [((y.start, y.end), (span.start, span.end)) for y in span.yi]

    # leading 0 mirrors the empty tensor prepended in the PyTorch forward
    group_sizes = [0] + [len(s.yi) for s in spans if len(s.yi)]
    probs = np.asarray(_ragged_softmax_device(coref_scores, group_sizes))
    probs = np.squeeze(probs)

    return spans, probs, coref_scores


# ---------------------------------- main --------------------------------------
if __name__ == "__main__":
    key = jax.random.PRNGKey(0)
    k_par, k_g, k_ms = jax.random.split(key, 3)
    params = init_params(k_par)

    # synthetic spans: 40 spans, each looks back at up to 5 previous spans
    n_spans, lookback = 40, 5
    spans = []
    for i in range(n_spans):
        g = GENRES[i % len(GENRES)] if i % 9 != 8 else "unk"   # exercise unknown genre -> 0
        spk = "A" if (i // 3) % 2 == 0 else "B"
        spans.append(Span(sid=i, start=3 * i, end=3 * i + 2, genre=g, speaker=spk))
    for i, s in enumerate(spans):
        s.yi = spans[max(0, i - lookback):i]

    g_i = jax.random.normal(k_g, (n_spans, GI_DIM), jnp.float32)
    mention_scores = jax.random.normal(k_ms, (n_spans, 1), jnp.float32)

    spans_out, probs, coref_scores = pairwise_score_forward(
        spans, g_i, mention_scores, params)
    jax.block_until_ready(coref_scores)

    assert coref_scores.shape == (sum(len(s.yi) for s in spans), 1)
    assert probs.shape == (1 + sum(1 for s in spans if len(s.yi)), lookback + 1)
    print("KERNEL_OK")
</pallas_src>

<mosaic_0001>
module attributes {stable_mosaic.version = 11 : i64} {
  func.func @pairwise_score_kernel(%arg0: i32, %arg1: memref<256x156xbf16, #tpu.memory_space<vmem>>, %arg2: memref<1x256xf32, #tpu.memory_space<vmem>>, %arg3: memref<156x150xbf16, #tpu.memory_space<vmem>>, %arg4: memref<1x150xf32, #tpu.memory_space<vmem>>, %arg5: memref<150x150xbf16, #tpu.memory_space<vmem>>, %arg6: memref<1x150xf32, #tpu.memory_space<vmem>>, %arg7: memref<1x150xbf16, #tpu.memory_space<vmem>>, %arg8: memref<1x256xf32, #tpu.memory_space<vmem>>) attributes {dimension_semantics = [#tpu.dimension_semantics<parallel>], iteration_bounds = array<i64: 1>, scalar_prefetch = 0 : i64, scratch_operands = 0 : i64, tpu.core_type = #tpu.core_type<tc>, window_params = [{transform_indices = @transform_0, window_bounds = array<i64: 256, 156>}, {transform_indices = @transform_1, window_bounds = array<i64: 1, 256>}, {pipeline_mode = #tpu.pipeline_mode<synchronous>, transform_indices = @transform_2, window_bounds = array<i64: 156, 150>}, {pipeline_mode = #tpu.pipeline_mode<synchronous>, transform_indices = @transform_3, window_bounds = array<i64: 1, 150>}, {pipeline_mode = #tpu.pipeline_mode<synchronous>, transform_indices = @transform_4, window_bounds = array<i64: 150, 150>}, {pipeline_mode = #tpu.pipeline_mode<synchronous>, transform_indices = @transform_5, window_bounds = array<i64: 1, 150>}, {pipeline_mode = #tpu.pipeline_mode<synchronous>, transform_indices = @transform_6, window_bounds = array<i64: 1, 150>}, {transform_indices = @transform_7, window_bounds = array<i64: 1, 256>}]} {
    %c0 = arith.constant 0 : index
    %c0_0 = arith.constant 0 : index
    %0 = vector.load %arg1[%c0, %c0_0] : memref<256x156xbf16, #tpu.memory_space<vmem>>, vector<256x156xbf16>
    %c0_1 = arith.constant 0 : index
    %c0_2 = arith.constant 0 : index
    %1 = vector.load %arg3[%c0_1, %c0_2] : memref<156x150xbf16, #tpu.memory_space<vmem>>, vector<156x150xbf16>
    %cst = arith.constant dense<0.000000e+00> : vector<256x150xf32>
    %2 = tpu.matmul %0, %1, %cst {dimension_numbers = #tpu.dot_dimension_numbers<[1], [0], [0], [1], [0, 0, 1, 1], [], []>} : vector<256x156xbf16>, vector<156x150xbf16>, vector<256x150xf32> -> vector<256x150xf32>
    %c0_3 = arith.constant 0 : index
    %c0_4 = arith.constant 0 : index
    %3 = vector.load %arg4[%c0_3, %c0_4] : memref<1x150xf32, #tpu.memory_space<vmem>>, vector<1x150xf32>
    %4 = vector.broadcast %3 : vector<1x150xf32> to vector<256x150xf32>
    %5 = arith.addf %2, %4 : vector<256x150xf32>
    %cst_5 = arith.constant 0.000000e+00 : f32
    %6 = vector.broadcast %cst_5 : f32 to vector<256x150xf32>
    %7 = arith.maximumf %5, %6 : vector<256x150xf32>
    %8 = arith.truncf %7 : vector<256x150xf32> to vector<256x150xbf16>
    %c0_6 = arith.constant 0 : index
    %c0_7 = arith.constant 0 : index
    %9 = vector.load %arg5[%c0_6, %c0_7] : memref<150x150xbf16, #tpu.memory_space<vmem>>, vector<150x150xbf16>
    %cst_8 = arith.constant dense<0.000000e+00> : vector<256x150xf32>
    %10 = tpu.matmul %8, %9, %cst_8 {dimension_numbers = #tpu.dot_dimension_numbers<[1], [0], [0], [1], [0, 0, 1, 1], [], []>} : vector<256x150xbf16>, vector<150x150xbf16>, vector<256x150xf32> -> vector<256x150xf32>
    %c0_9 = arith.constant 0 : index
    %c0_10 = arith.constant 0 : index
    %11 = vector.load %arg6[%c0_9, %c0_10] : memref<1x150xf32, #tpu.memory_space<vmem>>, vector<1x150xf32>
    %12 = vector.broadcast %11 : vector<1x150xf32> to vector<256x150xf32>
    %13 = arith.addf %10, %12 : vector<256x150xf32>
    %cst_11 = arith.constant 0.000000e+00 : f32
    %14 = vector.broadcast %cst_11 : f32 to vector<256x150xf32>
    %15 = arith.maximumf %13, %14 : vector<256x150xf32>
    %16 = arith.truncf %15 : vector<256x150xf32> to vector<256x150xbf16>
    %c0_12 = arith.constant 0 : index
    %c0_13 = arith.constant 0 : index
    %17 = vector.load %arg7[%c0_12, %c0_13] : memref<1x150xbf16, #tpu.memory_space<vmem>>, vector<1x150xbf16>
    %cst_14 = arith.constant dense<0.000000e+00> : vector<1x256xf32>
    %18 = tpu.matmul %17, %16, %cst_14 {dimension_numbers = #tpu.dot_dimension_numbers<[1], [1], [0], [0], [0, 0, 1, 0], [], []>} : vector<1x150xbf16>, vector<256x150xbf16>, vector<1x256xf32> -> vector<1x256xf32>
    %c0_15 = arith.constant 0 : index
    %c0_16 = arith.constant 0 : index
    %19 = vector.load %arg2[%c0_15, %c0_16] : memref<1x256xf32, #tpu.memory_space<vmem>>, vector<1x256xf32>
    %20 = arith.addf %18, %19 : vector<1x256xf32>
    %c0_17 = arith.constant 0 : index
    %c0_18 = arith.constant 0 : index
    %21 = vector.load %arg8[%c0_17, %c0_18] : memref<1x256xf32, #tpu.memory_space<vmem>>, vector<1x256xf32>
    tpu.vector_store %arg8[%c0_17, %c0_18], %20 {strides = array<i32>} : memref<1x256xf32, #tpu.memory_space<vmem>>, vector<1x256xf32>,
    return
  }
  func.func @transform_0(%arg0: i32) -> (i32, i32) {
    %c0_i32 = arith.constant 0 : i32
    %c0_i32_0 = arith.constant 0 : i32
    return %arg0, %c0_i32 : i32, i32
  }
  func.func @transform_1(%arg0: i32) -> (i32, i32) {
    %c0_i32 = arith.constant 0 : i32
    %c0_i32_0 = arith.constant 0 : i32
    return %c0_i32, %arg0 : i32, i32
  }
  func.func @transform_2(%arg0: i32) -> (i32, i32) {
    %c0_i32 = arith.constant 0 : i32
    %c0_i32_0 = arith.constant 0 : i32
    %c0_i32_1 = arith.constant 0 : i32
    return %c0_i32, %c0_i32_0 : i32, i32
  }
  func.func @transform_3(%arg0: i32) -> (i32, i32) {
    %c0_i32 = arith.constant 0 : i32
    %c0_i32_0 = arith.constant 0 : i32
    %c0_i32_1 = arith.constant 0 : i32
    return %c0_i32, %c0_i32_0 : i32, i32
  }
  func.func @transform_4(%arg0: i32) -> (i32, i32) {
    %c0_i32 = arith.constant 0 : i32
    %c0_i32_0 = arith.constant 0 : i32
    %c0_i32_1 = arith.constant 0 : i32
    return %c0_i32, %c0_i32_0 : i32, i32
  }
  func.func @transform_5(%arg0: i32) -> (i32, i32) {
    %c0_i32 = arith.constant 0 : i32
    %c0_i32_0 = arith.constant 0 : i32
    %c0_i32_1 = arith.constant 0 : i32
    return %c0_i32, %c0_i32_0 : i32, i32
  }
  func.func @transform_6(%arg0: i32) -> (i32, i32) {
    %c0_i32 = arith.constant 0 : i32
    %c0_i32_0 = arith.constant 0 : i32
    %c0_i32_1 = arith.constant 0 : i32
    return %c0_i32, %c0_i32_0 : i32, i32
  }
  func.func @transform_7(%arg0: i32) -> (i32, i32) {
    %c0_i32 = arith.constant 0 : i32
    %c0_i32_0 = arith.constant 0 : i32
    return %c0_i32, %arg0 : i32, i32
  }
}

</mosaic_0001>

<bundles_post_ra>
// kernel: tpu_custom_call.1
= control target key start
LH: loop header
LB: loop body
LE: loop exit
PB: predicated region body
PF: predicated region fallthrough
CT: control target
= control target key end

     0   :  { %vm334_vm0 = vcmask 228352   ;;  %vm383_vm1 = vcmask 1045504   ;;  %s2126_s0 = inlined_call_operand.vmem [shape: bf16[256,156], index: 0, kind: input, shape index: {}]   ;;  %s2127_s1 = inlined_call_operand.vmem [shape: f32[1,256], index: 1, kind: input, shape index: {}]   ;;  %s2128_s2 = inlined_call_operand.vmem [shape: bf16[156,150], index: 2, kind: input, shape index: {}]   ;;  %s2129_s3 = inlined_call_operand.vmem [shape: f32[1,150], index: 3, kind: input, shape index: {}]   ;;  %s2130_s4 = inlined_call_operand.vmem [shape: bf16[150,150], index: 4, kind: input, shape index: {}]   ;;  %s2131_s5 = inlined_call_operand.vmem [shape: f32[1,150], index: 5, kind: input, shape index: {}]   ;;  %s2132_s6 = inlined_call_operand.vmem [shape: bf16[1,150], index: 6, kind: input, shape index: {}]   ;;  %s2133_s7 = inlined_call_operand.hbm [shape: f32[1,256], index: 7, kind: output, shape index: {}]  }
   0x1   :  { %v1442_v0 = vld [vmem:[%s2128_s2 + $0x74] ss:$8 sps:$4 sm:$0xff]   ;;  %v1444_v1 = vld [vmem:[%s2128_s2 + $0x70] ss:$8 sps:$4 sm:$0xff]   ;;  %v1445_v2 = vld [vmem:[%s2128_s2 + $0x64] ss:$8 sps:$4 sm:$0xff]  }
   0x2   :  { %390 = vmatprep.subr.bf16.mxu0 %v1442_v0  ;;  %v1447_v3 = vld [vmem:[%s2128_s2 + $0x60] ss:$8 sps:$4 sm:$0xff]   ;;  %v1448_v4 = vld [vmem:[%s2128_s2 + $0x54] ss:$8 sps:$4 sm:$0xff]   ;;  %v1450_v5 = vld [vmem:[%s2128_s2 + $0x50] ss:$8 sps:$4 sm:$0xff]  }
   0x3   :  { %391 = vmatpush1.bf16.msra.mxu0 %v1444_v1  ;;  %v1451_v6 = vld [vmem:[%s2128_s2 + $0x44] ss:$8 sps:$4 sm:$0xff]   ;;  %v1453_v7 = vld [vmem:[%s2128_s2 + $0x40] ss:$8 sps:$4 sm:$0xff]   ;;  %v1454_v8 = vld [vmem:[%s2128_s2 + $0x34] ss:$8 sps:$4 sm:$0xff]  }
   0x4   :  { %392 = vmatprep.subr.bf16.mxu0 %v1445_v2  ;;  %v1474_v9 = vld [vmem:[%s2126_s0 + $0x4] ss:$8 sps:$4 sm:$0xff]   ;;  %v1456_v10 = vld [vmem:[%s2128_s2 + $0x30] ss:$8 sps:$4 sm:$0xff]   ;;  %v1459_v12 = vld [vmem:[%s2128_s2 + $0x20] ss:$8 sps:$4 sm:$0xff]  }
   0x5   :  { %v1457_v11 = vld [vmem:[%s2128_s2 + $0x24] ss:$8 sps:$4 sm:$0xff]   ;;  %1369 = vmatprep.mubr.msk.bf16.mxu0 %vm334_vm0, %v1474_v9  ;;  %v1460_v13 = vld [vmem:[%s2128_s2 + $0x14] ss:$8 sps:$4 sm:$0xff]   ;;  %v1462_v14 = vld [vmem:[%s2128_s2 + $0x10] ss:$8 sps:$4 sm:$0xff]  }
   0x6   :  { %v1463_v15 = vld [vmem:[%s2128_s2 + $0x4] ss:$8 sps:$4 sm:$0xff]   ;;  %v1465_v16 = vld [vmem:[%s2128_s2] ss:$8 sps:$4 sm:$0xff]   ;;  %v1520_v22 = vld [vmem:[%s2130_s4 + $0x74] ss:$8 sps:$4 sm:$0xff]  }
   0x7   :  { %393 = vmatpush1.bf16.msra.mxu0 %v1447_v3  ;;  %v1466_v17 = vld [vmem:[%s2128_s2 + $0x94] ss:$8 sps:$4 sm:$0x3f]   ;;  %v1468_v18 = vld [vmem:[%s2128_s2 + $0x90] ss:$8 sps:$4 sm:$0x3f]   ;;  %861 = vmatprep.subr.bf16.mxu1 %v1520_v22 }
   0x8   :  { %394 = vmatprep.subr.bf16.mxu0 %v1448_v4  ;;  %v385_v19 = vsel %vm383_vm1, %v1468_v18, 0  ;;  %v1469_v20 = vld [vmem:[%s2128_s2 + $0x84] ss:$8 sps:$4 sm:$0xff]   ;;  %v1471_v21 = vld [vmem:[%s2128_s2 + $0x80] ss:$8 sps:$4 sm:$0xff]  }
   0x9   :  { %v1522_v23 = vld [vmem:[%s2130_s4 + $0x70] ss:$8 sps:$4 sm:$0xff]   ;;  %v1523_v24 = vld [vmem:[%s2130_s4 + $0x64] ss:$8 sps:$4 sm:$0xff]   ;;  %v1472_v25 = vld [vmem:[%s2126_s0] ss:$8 sps:$4 sm:$0xff]  }
   0xa   :  { %862 = vmatpush1.bf16.msra.mxu1 %v1522_v23  ;;  %v1525_v26 = vld [vmem:[%s2130_s4 + $0x60] ss:$8 sps:$4 sm:$0xff]   ;;  %v1475_v27 = vld [vmem:[%s2126_s0 + $0x14] ss:$8 sps:$4 sm:$0xff]   ;;  %v1528_v29 = vld [vmem:[%s2130_s4 + $0x50] ss:$8 sps:$4 sm:$0xff]  }
   0xb   :  { %395 = vmatpush1.bf16.msra.mxu0 %v1450_v5  ;;  %863 = vmatprep.subr.bf16.mxu1 %v1523_v24  ;;  %v1526_v28 = vld [vmem:[%s2130_s4 + $0x54] ss:$8 sps:$4 sm:$0xff]   ;;  %v1529_v30 = vld [vmem:[%s2130_s4 + $0x44] ss:$8 sps:$4 sm:$0xff]  }
   0xc   :  { %396 = vmatprep.subr.bf16.mxu0 %v1451_v6 }
   0xe   :  { %864 = vmatpush1.bf16.msra.mxu1 %v1525_v26 }
   0xf   :  { %397 = vmatpush1.bf16.msra.mxu0 %v1453_v7  ;;  %865 = vmatprep.subr.bf16.mxu1 %v1526_v28 }
  0x10   :  { %398 = vmatprep.subr.bf16.mxu0 %v1454_v8 }
  0x13   :  { %399 = vmatpush1.bf16.msra.mxu0 %v1456_v10 }
  0x14   :  { %400 = vmatprep.subr.bf16.mxu0 %v1457_v11 }
  0x17   :  { %401 = vmatpush1.bf16.msra.mxu0 %v1459_v12 }
  0x18   :  { %402 = vmatprep.subr.bf16.mxu0 %v1460_v13 }
  0x1b   :  { %403 = vmatpush1.bf16.msra.mxu0 %v1462_v14 }
  0x1c   :  { %404 = vmatprep.subr.bf16.mxu0 %v1463_v15 }
  0x1f   :  { %405 = vmatpush1.bf16.msra.mxu0 %v1465_v16 }
  0x20   :  { %1368 = vmatprep.subr.msk.bf16.mxu0 %vm383_vm1, %v1466_v17 }
  0x23   :  { %419 = vmatpush2.bf16.msra.mxu0 %v385_v19 }
  0x24   :  { %420 = vmatprep.subr.bf16.mxu0 %v1469_v20 }
  0x27   :  { %421 = vmatpush2.bf16.msra.mxu0 %v1471_v21 }
  0x2a   :  { %423 = vmatmul.mubr.bf16.vlgmr.msra.gmra.mxu0 %v1472_v25 }
  0x2b   :  { %1370 = vmatprep.mubr.msk.bf16.mxu0 %vm334_vm0, %v1475_v27 }
  0x2c   :  { %12 = vsyncpa [#allocation3], 0  ;;  %v1477_v31 = vld [vmem:[%s2126_s0 + $0x10] ss:$8 sps:$4 sm:$0xff]   ;;  %866 = vmatpush1.bf16.msra.mxu1 %v1528_v29  ;;  %v1531_v32 = vld [vmem:[%s2130_s4 + $0x40] ss:$8 sps:$4 sm:$0xff]   ;;  %v82_v11 = vlaneseq }
  0x2d   :  { %v1478_v33 = vld [vmem:[%s2126_s0 + $0x24] ss:$8 sps:$4 sm:$0xff]   ;;  %867 = vmatprep.subr.bf16.mxu1 %v1529_v30  ;;  %v1532_v34 = vld [vmem:[%s2130_s4 + $0x34] ss:$8 sps:$4 sm:$0xff]   ;;  %v1534_v35 = vld [vmem:[%s2130_s4 + $0x30] ss:$8 sps:$4 sm:$0xff]  }
  0x2e   :  { %v1535_v36 = vld [vmem:[%s2130_s4 + $0x24] ss:$8 sps:$4 sm:$0xff]   ;;  %v1480_v37 = vld [vmem:[%s2126_s0 + $0x20] ss:$8 sps:$4 sm:$0xff]   ;;  %v1481_v39 = vld [vmem:[%s2126_s0 + $0x34] ss:$8 sps:$4 sm:$0xff]  }
  0x2f   :  { %v1537_v38 = vld [vmem:[%s2130_s4 + $0x20] ss:$8 sps:$4 sm:$0xff]   ;;  %v1538_v40 = vld [vmem:[%s2130_s4 + $0x14] ss:$8 sps:$4 sm:$0xff]   ;;  %v1540_v41 = vld [vmem:[%s2130_s4 + $0x10] ss:$8 sps:$4 sm:$0xff]  }
  0x30   :  { %868 = vmatpush1.bf16.msra.mxu1 %v1531_v32  ;;  %v1483_v42 = vld [vmem:[%s2126_s0 + $0x30] ss:$8 sps:$4 sm:$0xff]   ;;  %v1484_v43 = vld [vmem:[%s2126_s0 + $0x44] ss:$8 sps:$4 sm:$0xff]   ;;  %v1486_v44 = vld [vmem:[%s2126_s0 + $0x40] ss:$8 sps:$4 sm:$0xff]  }
  0x31   :  { %869 = vmatprep.subr.bf16.mxu1 %v1532_v34  ;;  %v1487_v45 = vld [vmem:[%s2126_s0 + $0x54] ss:$8 sps:$4 sm:$0xff]   ;;  %v1489_v46 = vld [vmem:[%s2126_s0 + $0x50] ss:$8 sps:$4 sm:$0xff]   ;;  %v1490_v47 = vld [vmem:[%s2126_s0 + $0x64] ss:$8 sps:$4 sm:$0xff]  }
  0x32   :  { %433 = vmatmul.mubr.bf16.gmra.mxu0 %v1477_v31  ;;  %v1492_v48 = vld [vmem:[%s2126_s0 + $0x60] ss:$8 sps:$4 sm:$0xff]   ;;  %v1493_v49 = vld [vmem:[%s2126_s0 + $0x74] ss:$8 sps:$4 sm:$0xff]   ;;  %v1495_v50 = vld [vmem:[%s2126_s0 + $0x70] ss:$8 sps:$4 sm:$0xff]  }
  0x33   :  { %1371 = vmatprep.mubr.msk.bf16.mxu0 %vm334_vm0, %v1478_v33  ;;  %v1496_v51 = vld [vmem:[%s2126_s0 + $0x84] ss:$8 sps:$4 sm:$0xff]   ;;  %v1498_v52 = vld [vmem:[%s2126_s0 + $0x80] ss:$8 sps:$4 sm:$0xff]   ;;  %v1499_v53 = vld [vmem:[%s2126_s0 + $0x94] ss:$8 sps:$4 sm:$0xff]  }
  0x34   :  { %870 = vmatpush1.bf16.msra.mxu1 %v1534_v35  ;;  %v1541_v54 = vld [vmem:[%s2130_s4 + $0x4] ss:$8 sps:$4 sm:$0xff]   ;;  %v1543_v55 = vld [vmem:[%s2130_s4] ss:$8 sps:$4 sm:$0xff]   ;;  %v697_v56 = vld [vmem:[%s2130_s4 + $0x90] sm:$0x77] }
  0x35   :  { %871 = vmatprep.subr.bf16.mxu1 %v1535_v36  ;;  %v1501_v57 = vld [vmem:[%s2126_s0 + $0x90] ss:$8 sps:$4 sm:$0xff]   ;;  %v1404_v58 = vcombine.high %v697_v56, %v697_v56  ;;  %v1403_v59 = vcombine.low %v697_v56, %v697_v56  ;;  %v1502_v60 = vld [vmem:[%s2126_s0 + $0xa4] ss:$8 sps:$4 sm:$0xff]   ;;  %vm854_vm2 = vcmask 1042432   ;;  %v1843_v12 = vshrl.u32 %v82_v11, 7 }
  0x36   :  { %v1546_v62 = vld [vmem:[%s2130_s4 + $0x84] ss:$8 sps:$4 sm:$0xff]   ;;  %v1548_v63 = vld [vmem:[%s2130_s4 + $0x80] ss:$8 sps:$4 sm:$0xff]   ;;  %v1505_v1 = vld [vmem:[%s2126_s0 + $0xb4] ss:$8 sps:$4 sm:$0xff]  }
  0x37   :  { %v856_v61 = vsel %vm854_vm2, %v1403_v59, 0  ;;  %v1504_v0 = vld [vmem:[%s2126_s0 + $0xa0] ss:$8 sps:$4 sm:$0xff]   ;;  %v1507_v2 = vld [vmem:[%s2126_s0 + $0xb0] ss:$8 sps:$4 sm:$0xff]   ;;  %v1846_v13 = vsub.s32 1, %v1843_v12 }
  0x38   :  { %872 = vmatpush1.bf16.msra.mxu1 %v1537_v38  ;;  %v1508_v3 = vld [vmem:[%s2126_s0 + $0xc4] ss:$8 sps:$4 sm:$0xff]   ;;  %v1510_v4 = vld [vmem:[%s2126_s0 + $0xc0] ss:$8 sps:$4 sm:$0xff]   ;;  %v1511_v5 = vld [vmem:[%s2126_s0 + $0xd4] ss:$8 sps:$4 sm:$0xff]  }
  0x39   :  { %873 = vmatprep.subr.bf16.mxu1 %v1538_v40  ;;  %v1513_v6 = vld [vmem:[%s2126_s0 + $0xd0] ss:$8 sps:$4 sm:$0xff]   ;;  %v1514_v7 = vld [vmem:[%s2126_s0 + $0xe4] ss:$8 sps:$4 sm:$0xff]   ;;  %v1516_v8 = vld [vmem:[%s2126_s0 + $0xe0] ss:$8 sps:$4 sm:$0xff]  }
  0x3a   :  { %443 = vmatmul.mubr.bf16.gmra.mxu0 %v1480_v37  ;;  %v1517_v9 = vld [vmem:[%s2126_s0 + $0xf4] ss:$8 sps:$4 sm:$0xff]   ;;  %v1519_v10 = vld [vmem:[%s2126_s0 + $0xf0] ss:$8 sps:$4 sm:$0xff]   ;;  %v1849_v14 = vsub.s32 0, %v1843_v12  ;;  %vm805_vm3 = vcmask 179200  }
  0x3b   :  { %1372 = vmatprep.mubr.msk.bf16.mxu0 %vm334_vm0, %v1481_v39  ;;  %v80_v15 = vld [vmem:[%s2129_s3] sm:$0x3]  ;;  %s1572_s27 = smov [#allocation2]   ;;  %vm1299_vm4 = vcmp.lt.s32.totalorder %v82_v11, 256 }
  0x3c   :  { %874 = vmatpush1.bf16.msra.mxu1 %v1540_v41  ;;  %v1855_v17 = vrot.slane %v80_v15, %v1846_v13  ;;  %v1858_v18 = vrot.slane %v80_v15, %v1849_v14  ;;  %s1308_s2 = sshll.u32 %s1572_s27, 4  ;;  %s1309_s2 = int_to_ptr.vmem [resolvable:$true] %s1308_s2 }
  0x3d   :  { %875 = vmatprep.subr.bf16.mxu1 %v1541_v54  ;;  %p1554_p1 = scmp.lt.s32.totalorder %s1309_s2, %s1309_s2 }
  0x40   :  { %876 = vmatpush1.bf16.msra.mxu1 %v1543_v55 }
  0x41   :  { %1405 = vmatprep.subr.msk.bf16.mxu1 %vm854_vm2, %v1404_v58 }
  0x42   :  { %453 = vmatmul.mubr.bf16.gmra.mxu0 %v1483_v42 }
  0x43   :  { %1373 = vmatprep.mubr.msk.bf16.mxu0 %vm334_vm0, %v1484_v43 }
  0x44   :  { %890 = vmatpush2.bf16.msra.mxu1 %v856_v61 }
  0x45   :  { %891 = vmatprep.subr.bf16.mxu1 %v1546_v62 }
  0x48   :  { %892 = vmatpush2.bf16.msra.mxu1 %v1548_v63 }
  0x4a   :  { %463 = vmatmul.mubr.bf16.gmra.mxu0 %v1486_v44 }
  0x4b   :  { %1374 = vmatprep.mubr.msk.bf16.mxu0 %vm334_vm0, %v1487_v45 }
  0x52   :  { %473 = vmatmul.mubr.bf16.gmra.mxu0 %v1489_v46 }
  0x53   :  { %1375 = vmatprep.mubr.msk.bf16.mxu0 %vm334_vm0, %v1490_v47 }
  0x5a   :  { %483 = vmatmul.mubr.bf16.gmra.mxu0 %v1492_v48 }
  0x5b   :  { %1376 = vmatprep.mubr.msk.bf16.mxu0 %vm334_vm0, %v1493_v49 }
  0x62   :  { %493 = vmatmul.mubr.bf16.gmra.mxu0 %v1495_v50 }
  0x63   :  { %1377 = vmatprep.mubr.msk.bf16.mxu0 %vm334_vm0, %v1496_v51 }
  0x6a   :  { %503 = vmatmul.mubr.bf16.gmra.mxu0 %v1498_v52 }
  0x6b   :  { %1378 = vmatprep.mubr.msk.bf16.mxu0 %vm334_vm0, %v1499_v53 }
  0x72   :  { %513 = vmatmul.mubr.bf16.gmra.mxu0 %v1501_v57 }
  0x73   :  { %1379 = vmatprep.mubr.msk.bf16.mxu0 %vm334_vm0, %v1502_v60 }
  0x7a   :  { %523 = vmatmul.mubr.bf16.gmra.mxu0 %v1504_v0 }
  0x7b   :  { %1380 = vmatprep.mubr.msk.bf16.mxu0 %vm334_vm0, %v1505_v1 }
  0x82   :  { %533 = vmatmul.mubr.bf16.gmra.mxu0 %v1507_v2 }
  0x83   :  { %1381 = vmatprep.mubr.msk.bf16.mxu0 %vm334_vm0, %v1508_v3 }
  0x8a   :  { %543 = vmatmul.mubr.bf16.gmra.mxu0 %v1510_v4 }
  0x8b   :  { %1382 = vmatprep.mubr.msk.bf16.mxu0 %vm334_vm0, %v1511_v5 }
  0x92   :  { %553 = vmatmul.mubr.bf16.gmra.mxu0 %v1513_v6 }
  0x93   :  { %1383 = vmatprep.mubr.msk.bf16.mxu0 %vm334_vm0, %v1514_v7 }
  0x9a   :  { %563 = vmatmul.mubr.bf16.gmra.mxu0 %v1516_v8 }
  0x9b   :  { %1384 = vmatprep.mubr.msk.bf16.mxu0 %vm334_vm0, %v1517_v9 }
  0xa2   :  { %573 = vmatmul.mubr.bf16.gmra.mxu0 %v1519_v10 }
  0xea   :  { %v424_v16 = vpop.f32.mrf.mxu0 }
  0xeb   :  { %v425_v23 = vadd.f32 %v424_v16, %v1858_v18 }
  0xec   :  { %v426_v19 = vpop.f32.mrf.mxu0 }
  0xed   :  { %v427_v21 = vadd.f32 %v426_v19, %v1855_v17  ;;  %v583_v30 = vmax.f32 %v425_v23, 0.0 }
  0xee   :  { %v428_v20 = vpop.f32.mrf.mxu0 }
  0xef   :  { %v429_v22 = vadd.f32 %v428_v20, %v1858_v18  ;;  %v584_v28 = vmax.f32 %v427_v21, 0.0 }
  0xf0   :  { %v430_v24 = vpop.f32.mrf.mxu0 }
  0xf1   :  { %v431_v25 = vadd.f32 %v430_v24, %v1855_v17  ;;  %v585_v26 = vmax.f32 %v429_v22, 0.0 }
  0xf2   :  { %v434_v27 = vpop.f32.mrf.mxu0 }
  0xf3   :  { %v586_v29 = vmax.f32 %v431_v25, 0.0  ;;  %v647_v33 = vpack.c.bf16 %v585_v26, %v583_v30  ;;  %v435_v37 = vadd.f32 %v434_v27, %v1858_v18 }
  0xf4   :  { %v436_v31 = vpop.f32.mrf.mxu0 }
  0xf5   :  { %v648_v32 = vpack.c.bf16 %v586_v29, %v584_v28  ;;  %v437_v35 = vadd.f32 %v436_v31, %v1855_v17  ;;  %v587_v44 = vmax.f32 %v435_v37, 0.0 }
  0xf6   :  { %v438_v34 = vpop.f32.mrf.mxu0 }
  0xf7   :  { %v439_v36 = vadd.f32 %v438_v34, %v1858_v18  ;;  %1406 = vmatprep.mubr.msk.bf16.mxu1 %vm805_vm3, %v648_v32  ;;  %v588_v42 = vmax.f32 %v437_v35, 0.0 }
  0xf8   :  { %v440_v38 = vpop.f32.mrf.mxu0  ;;  %894 = vmatmul.mubr.bf16.vlgmr.msra.gmra.mxu1 %v647_v33 }
  0xf9   :  { %v441_v39 = vadd.f32 %v440_v38, %v1855_v17  ;;  %v589_v40 = vmax.f32 %v439_v36, 0.0 }
  0xfa   :  { %v444_v41 = vpop.f32.mrf.mxu0 }
  0xfb   :  { %v590_v43 = vmax.f32 %v441_v39, 0.0  ;;  %v649_v47 = vpack.c.bf16 %v589_v40, %v587_v44  ;;  %v445_v51 = vadd.f32 %v444_v41, %v1858_v18 }
  0xfc   :  { %v446_v45 = vpop.f32.mrf.mxu0 }
  0xfd   :  { %v650_v46 = vpack.c.bf16 %v590_v43, %v588_v42  ;;  %v447_v49 = vadd.f32 %v446_v45, %v1855_v17  ;;  %v591_v58 = vmax.f32 %v445_v51, 0.0 }
  0xfe   :  { %v448_v48 = vpop.f32.mrf.mxu0 }
  0xff   :  { %v449_v50 = vadd.f32 %v448_v48, %v1858_v18  ;;  %1407 = vmatprep.mubr.msk.bf16.mxu1 %vm805_vm3, %v650_v46  ;;  %v592_v56 = vmax.f32 %v447_v49, 0.0 }
 0x100   :  { %v450_v52 = vpop.f32.mrf.mxu0  ;;  %904 = vmatmul.mubr.bf16.gmra.mxu1 %v649_v47 }
 0x101   :  { %v451_v53 = vadd.f32 %v450_v52, %v1855_v17  ;;  %v593_v54 = vmax.f32 %v449_v50, 0.0 }
 0x102   :  { %v454_v55 = vpop.f32.mrf.mxu0 }
 0x103   :  { %v594_v57 = vmax.f32 %v451_v53, 0.0  ;;  %v651_v61 = vpack.c.bf16 %v593_v54, %v591_v58  ;;  %v455_v1 = vadd.f32 %v454_v55, %v1858_v18 }
 0x104   :  { %v456_v59 = vpop.f32.mrf.mxu0 }
 0x105   :  { %v652_v60 = vpack.c.bf16 %v594_v57, %v592_v56  ;;  %v457_v63 = vadd.f32 %v456_v59, %v1855_v17  ;;  %v595_v8 = vmax.f32 %v455_v1, 0.0 }
 0x106   :  { %v458_v62 = vpop.f32.mrf.mxu0 }
 0x107   :  { %v459_v0 = vadd.f32 %v458_v62, %v1858_v18  ;;  %1408 = vmatprep.mubr.msk.bf16.mxu1 %vm805_vm3, %v652_v60  ;;  %v596_v6 = vmax.f32 %v457_v63, 0.0 }
 0x108   :  { %v460_v2 = vpop.f32.mrf.mxu0  ;;  %914 = vmatmul.mubr.bf16.gmra.mxu1 %v651_v61 }
 0x109   :  { %v461_v3 = vadd.f32 %v460_v2, %v1855_v17  ;;  %v597_v4 = vmax.f32 %v459_v0, 0.0 }
 0x10a   :  { %v464_v5 = vpop.f32.mrf.mxu0 }
 0x10b   :  { %v598_v7 = vmax.f32 %v461_v3, 0.0  ;;  %v653_v15 = vpack.c.bf16 %v597_v4, %v595_v8  ;;  %v465_v21 = vadd.f32 %v464_v5, %v1858_v18 }
 0x10c   :  { %v466_v9 = vpop.f32.mrf.mxu0 }
 0x10d   :  { %v654_v10 = vpack.c.bf16 %v598_v7, %v596_v6  ;;  %v467_v19 = vadd.f32 %v466_v9, %v1855_v17  ;;  %v599_v28 = vmax.f32 %v465_v21, 0.0 }
 0x10e   :  { %v468_v16 = vpop.f32.mrf.mxu0 }
 0x10f   :  { %v469_v20 = vadd.f32 %v468_v16, %v1858_v18  ;;  %1409 = vmatprep.mubr.msk.bf16.mxu1 %vm805_vm3, %v654_v10  ;;  %v600_v26 = vmax.f32 %v467_v19, 0.0 }
 0x110   :  { %v470_v22 = vpop.f32.mrf.mxu0  ;;  %924 = vmatmul.mubr.bf16.gmra.mxu1 %v653_v15 }
 0x111   :  { %v471_v23 = vadd.f32 %v470_v22, %v1855_v17  ;;  %v601_v24 = vmax.f32 %v469_v20, 0.0 }
 0x112   :  { %v474_v25 = vpop.f32.mrf.mxu0 }
 0x113   :  { %v602_v27 = vmax.f32 %v471_v23, 0.0  ;;  %v655_v31 = vpack.c.bf16 %v601_v24, %v599_v28  ;;  %v475_v35 = vadd.f32 %v474_v25, %v1858_v18 }
 0x114   :  { %v476_v29 = vpop.f32.mrf.mxu0 }
 0x115   :  { %v656_v30 = vpack.c.bf16 %v602_v27, %v600_v26  ;;  %v477_v33 = vadd.f32 %v476_v29, %v1855_v17  ;;  %v603_v42 = vmax.f32 %v475_v35, 0.0 }
 0x116   :  { %v478_v32 = vpop.f32.mrf.mxu0 }
 0x117   :  { %v479_v34 = vadd.f32 %v478_v32, %v1858_v18  ;;  %1410 = vmatprep.mubr.msk.bf16.mxu1 %vm805_vm3, %v656_v30  ;;  %v604_v40 = vmax.f32 %v477_v33, 0.0 }
 0x118   :  { %v480_v36 = vpop.f32.mrf.mxu0  ;;  %934 = vmatmul.mubr.bf16.gmra.mxu1 %v655_v31 }
 0x119   :  { %v481_v37 = vadd.f32 %v480_v36, %v1855_v17  ;;  %v605_v38 = vmax.f32 %v479_v34, 0.0 }
 0x11a   :  { %v484_v39 = vpop.f32.mrf.mxu0 }
 0x11b   :  { %v606_v41 = vmax.f32 %v481_v37, 0.0  ;;  %v657_v45 = vpack.c.bf16 %v605_v38, %v603_v42  ;;  %v485_v49 = vadd.f32 %v484_v39, %v1858_v18 }
 0x11c   :  { %v486_v43 = vpop.f32.mrf.mxu0 }
 0x11d   :  { %v658_v44 = vpack.c.bf16 %v606_v41, %v604_v40  ;;  %v487_v47 = vadd.f32 %v486_v43, %v1855_v17  ;;  %v607_v56 = vmax.f32 %v485_v49, 0.0 }
 0x11e   :  { %v488_v46 = vpop.f32.mrf.mxu0 }
 0x11f   :  { %v489_v48 = vadd.f32 %v488_v46, %v1858_v18  ;;  %1411 = vmatprep.mubr.msk.bf16.mxu1 %vm805_vm3, %v658_v44  ;;  %v608_v54 = vmax.f32 %v487_v47, 0.0 }
 0x120   :  { %v490_v50 = vpop.f32.mrf.mxu0  ;;  %944 = vmatmul.mubr.bf16.gmra.mxu1 %v657_v45 }
 0x121   :  { %v491_v51 = vadd.f32 %v490_v50, %v1855_v17  ;;  %v609_v52 = vmax.f32 %v489_v48, 0.0 }
 0x122   :  { %v494_v53 = vpop.f32.mrf.mxu0 }
 0x123   :  { %v610_v55 = vmax.f32 %v491_v51, 0.0  ;;  %v659_v59 = vpack.c.bf16 %v609_v52, %v607_v56  ;;  %v495_v63 = vadd.f32 %v494_v53, %v1858_v18 }
 0x124   :  { %v496_v57 = vpop.f32.mrf.mxu0 }
 0x125   :  { %v660_v58 = vpack.c.bf16 %v610_v55, %v608_v54  ;;  %v497_v61 = vadd.f32 %v496_v57, %v1855_v17  ;;  %v611_v6 = vmax.f32 %v495_v63, 0.0 }
 0x126   :  { %v498_v60 = vpop.f32.mrf.mxu0 }
 0x127   :  { %v499_v62 = vadd.f32 %v498_v60, %v1858_v18  ;;  %1412 = vmatprep.mubr.msk.bf16.mxu1 %vm805_vm3, %v660_v58  ;;  %v612_v4 = vmax.f32 %v497_v61, 0.0 }
 0x128   :  { %v500_v0 = vpop.f32.mrf.mxu0  ;;  %954 = vmatmul.mubr.bf16.gmra.mxu1 %v659_v59 }
 0x129   :  { %v501_v1 = vadd.f32 %v500_v0, %v1855_v17  ;;  %v613_v2 = vmax.f32 %v499_v62, 0.0 }
 0x12a   :  { %v504_v3 = vpop.f32.mrf.mxu0 }
 0x12b   :  { %v614_v5 = vmax.f32 %v501_v1, 0.0  ;;  %v661_v9 = vpack.c.bf16 %v613_v2, %v611_v6  ;;  %v505_v19 = vadd.f32 %v504_v3, %v1858_v18 }
 0x12c   :  { %v506_v7 = vpop.f32.mrf.mxu0 }
 0x12d   :  { %v662_v8 = vpack.c.bf16 %v614_v5, %v612_v4  ;;  %v507_v15 = vadd.f32 %v506_v7, %v1855_v17  ;;  %v615_v26 = vmax.f32 %v505_v19, 0.0 }
 0x12e   :  { %v508_v10 = vpop.f32.mrf.mxu0 }
 0x12f   :  { %v509_v16 = vadd.f32 %v508_v10, %v1858_v18  ;;  %1413 = vmatprep.mubr.msk.bf16.mxu1 %vm805_vm3, %v662_v8  ;;  %v616_v24 = vmax.f32 %v507_v15, 0.0 }
 0x130   :  { %v510_v20 = vpop.f32.mrf.mxu0  ;;  %964 = vmatmul.mubr.bf16.gmra.mxu1 %v661_v9 }
 0x131   :  { %v511_v21 = vadd.f32 %v510_v20, %v1855_v17  ;;  %v617_v22 = vmax.f32 %v509_v16, 0.0 }
 0x132   :  { %v514_v23 = vpop.f32.mrf.mxu0 }
 0x133   :  { %v618_v25 = vmax.f32 %v511_v21, 0.0  ;;  %v663_v29 = vpack.c.bf16 %v617_v22, %v615_v26  ;;  %v515_v33 = vadd.f32 %v514_v23, %v1858_v18 }
 0x134   :  { %v516_v27 = vpop.f32.mrf.mxu0 }
 0x135   :  { %v664_v28 = vpack.c.bf16 %v618_v25, %v616_v24  ;;  %v517_v31 = vadd.f32 %v516_v27, %v1855_v17  ;;  %v619_v40 = vmax.f32 %v515_v33, 0.0 }
 0x136   :  { %v518_v30 = vpop.f32.mrf.mxu0 }
 0x137   :  { %v519_v32 = vadd.f32 %v518_v30, %v1858_v18  ;;  %1414 = vmatprep.mubr.msk.bf16.mxu1 %vm805_vm3, %v664_v28  ;;  %v620_v38 = vmax.f32 %v517_v31, 0.0 }
 0x138   :  { %v520_v34 = vpop.f32.mrf.mxu0  ;;  %974 = vmatmul.mubr.bf16.gmra.mxu1 %v663_v29 }
 0x139   :  { %v521_v35 = vadd.f32 %v520_v34, %v1855_v17  ;;  %v621_v36 = vmax.f32 %v519_v32, 0.0 }
 0x13a   :  { %v524_v37 = vpop.f32.mrf.mxu0 }
 0x13b   :  { %v622_v39 = vmax.f32 %v521_v35, 0.0  ;;  %v665_v43 = vpack.c.bf16 %v621_v36, %v619_v40  ;;  %v525_v47 = vadd.f32 %v524_v37, %v1858_v18 }
 0x13c   :  { %v526_v41 = vpop.f32.mrf.mxu0 }
 0x13d   :  { %v666_v42 = vpack.c.bf16 %v622_v39, %v620_v38  ;;  %v527_v45 = vadd.f32 %v526_v41, %v1855_v17  ;;  %v623_v54 = vmax.f32 %v525_v47, 0.0 }
 0x13e   :  { %v528_v44 = vpop.f32.mrf.mxu0 }
 0x13f   :  { %v529_v46 = vadd.f32 %v528_v44, %v1858_v18  ;;  %1415 = vmatprep.mubr.msk.bf16.mxu1 %vm805_vm3, %v666_v42  ;;  %v624_v52 = vmax.f32 %v527_v45, 0.0 }
 0x140   :  { %v530_v48 = vpop.f32.mrf.mxu0  ;;  %984 = vmatmul.mubr.bf16.gmra.mxu1 %v665_v43 }
 0x141   :  { %v531_v49 = vadd.f32 %v530_v48, %v1855_v17  ;;  %v625_v50 = vmax.f32 %v529_v46, 0.0 }
 0x142   :  { %v534_v51 = vpop.f32.mrf.mxu0 }
 0x143   :  { %v626_v53 = vmax.f32 %v531_v49, 0.0  ;;  %v667_v57 = vpack.c.bf16 %v625_v50, %v623_v54  ;;  %v535_v61 = vadd.f32 %v534_v51, %v1858_v18 }
 0x144   :  { %v536_v55 = vpop.f32.mrf.mxu0 }
 0x145   :  { %v668_v56 = vpack.c.bf16 %v626_v53, %v624_v52  ;;  %v537_v59 = vadd.f32 %v536_v55, %v1855_v17  ;;  %v627_v4 = vmax.f32 %v535_v61, 0.0 }
 0x146   :  { %v538_v58 = vpop.f32.mrf.mxu0 }
 0x147   :  { %v539_v60 = vadd.f32 %v538_v58, %v1858_v18  ;;  %1416 = vmatprep.mubr.msk.bf16.mxu1 %vm805_vm3, %v668_v56  ;;  %v628_v2 = vmax.f32 %v537_v59, 0.0 }
 0x148   :  { %v540_v62 = vpop.f32.mrf.mxu0  ;;  %994 = vmatmul.mubr.bf16.gmra.mxu1 %v667_v57 }
 0x149   :  { %v541_v63 = vadd.f32 %v540_v62, %v1855_v17  ;;  %v629_v0 = vmax.f32 %v539_v60, 0.0 }
 0x14a   :  { %v544_v1 = vpop.f32.mrf.mxu0 }
 0x14b   :  { %v630_v3 = vmax.f32 %v541_v63, 0.0  ;;  %v669_v7 = vpack.c.bf16 %v629_v0, %v627_v4  ;;  %v545_v15 = vadd.f32 %v544_v1, %v1858_v18  ;;  %v698_v4 = vld [vmem:[%s2131_s5] sm:$0x3] }
 0x14c   :  { %v546_v5 = vpop.f32.mrf.mxu0 }
 0x14d   :  { %v670_v6 = vpack.c.bf16 %v630_v3, %v628_v2  ;;  %v547_v9 = vadd.f32 %v546_v5, %v1855_v17  ;;  %v631_v24 = vmax.f32 %v545_v15, 0.0  ;;  %v1944_v5 = vrot.slane %v698_v4, %v1849_v14 }
 0x14e   :  { %v548_v8 = vpop.f32.mrf.mxu0 }
 0x14f   :  { %v549_v10 = vadd.f32 %v548_v8, %v1858_v18  ;;  %1417 = vmatprep.mubr.msk.bf16.mxu1 %vm805_vm3, %v670_v6  ;;  %v632_v22 = vmax.f32 %v547_v9, 0.0  ;;  %v1947_v6 = vrot.slane %v698_v4, %v1846_v13 }
 0x150   :  { %v550_v16 = vpop.f32.mrf.mxu0  ;;  %1004 = vmatmul.mubr.bf16.gmra.mxu1 %v669_v7 }
 0x151   :  { %v551_v19 = vadd.f32 %v550_v16, %v1855_v17  ;;  %v633_v20 = vmax.f32 %v549_v10, 0.0 }
 0x152   :  { %v554_v21 = vpop.f32.mrf.mxu0 }
 0x153   :  { %v634_v23 = vmax.f32 %v551_v19, 0.0  ;;  %v671_v27 = vpack.c.bf16 %v633_v20, %v631_v24  ;;  %v555_v31 = vadd.f32 %v554_v21, %v1858_v18 }
 0x154   :  { %v556_v25 = vpop.f32.mrf.mxu0 }
 0x155   :  { %v672_v26 = vpack.c.bf16 %v634_v23, %v632_v22  ;;  %v557_v29 = vadd.f32 %v556_v25, %v1855_v17  ;;  %v635_v38 = vmax.f32 %v555_v31, 0.0 }
 0x156   :  { %v558_v28 = vpop.f32.mrf.mxu0 }
 0x157   :  { %v559_v30 = vadd.f32 %v558_v28, %v1858_v18  ;;  %1418 = vmatprep.mubr.msk.bf16.mxu1 %vm805_vm3, %v672_v26  ;;  %v636_v36 = vmax.f32 %v557_v29, 0.0 }
 0x158   :  { %v560_v32 = vpop.f32.mrf.mxu0  ;;  %1014 = vmatmul.mubr.bf16.gmra.mxu1 %v671_v27 }
 0x159   :  { %v561_v33 = vadd.f32 %v560_v32, %v1855_v17  ;;  %v637_v34 = vmax.f32 %v559_v30, 0.0 }
 0x15a   :  { %v564_v35 = vpop.f32.mrf.mxu0 }
 0x15b   :  { %v638_v37 = vmax.f32 %v561_v33, 0.0  ;;  %v673_v41 = vpack.c.bf16 %v637_v34, %v635_v38  ;;  %v565_v45 = vadd.f32 %v564_v35, %v1858_v18 }
 0x15c   :  { %v566_v39 = vpop.f32.mrf.mxu0 }
 0x15d   :  { %v674_v40 = vpack.c.bf16 %v638_v37, %v636_v36  ;;  %v567_v43 = vadd.f32 %v566_v39, %v1855_v17  ;;  %v639_v52 = vmax.f32 %v565_v45, 0.0 }
 0x15e   :  { %v568_v42 = vpop.f32.mrf.mxu0 }
 0x15f   :  { %v569_v44 = vadd.f32 %v568_v42, %v1858_v18  ;;  %1419 = vmatprep.mubr.msk.bf16.mxu1 %vm805_vm3, %v674_v40  ;;  %v640_v50 = vmax.f32 %v567_v43, 0.0 }
 0x160   :  { %v570_v46 = vpop.f32.mrf.mxu0  ;;  %1024 = vmatmul.mubr.bf16.gmra.mxu1 %v673_v41 }
 0x161   :  { %v571_v47 = vadd.f32 %v570_v46, %v1855_v17  ;;  %v641_v48 = vmax.f32 %v569_v44, 0.0 }
 0x162   :  { %v574_v49 = vpop.f32.mrf.mxu0 }
 0x163   :  { %v642_v51 = vmax.f32 %v571_v47, 0.0  ;;  %v675_v55 = vpack.c.bf16 %v641_v48, %v639_v52  ;;  %v575_v59 = vadd.f32 %v574_v49, %v1858_v18 }
 0x164   :  { %v576_v53 = vpop.f32.mrf.mxu0 }
 0x165   :  { %v676_v54 = vpack.c.bf16 %v642_v51, %v640_v50  ;;  %v577_v57 = vadd.f32 %v576_v53, %v1855_v17  ;;  %v643_v1 = vmax.f32 %v575_v59, 0.0 }
 0x166   :  { %v578_v56 = vpop.f32.mrf.mxu0 }
 0x167   :  { %v579_v58 = vadd.f32 %v578_v56, %v1858_v18  ;;  %1420 = vmatprep.mubr.msk.bf16.mxu1 %vm805_vm3, %v676_v54  ;;  %v644_v63 = vmax.f32 %v577_v57, 0.0 }
 0x168   :  { %v580_v60 = vpop.f32.mrf.mxu0  ;;  %1034 = vmatmul.mubr.bf16.gmra.mxu1 %v675_v55 }
 0x169   :  { %v581_v61 = vadd.f32 %v580_v60, %v1855_v17  ;;  %v645_v62 = vmax.f32 %v579_v58, 0.0 }
 0x16b   :  { %v646_v0 = vmax.f32 %v581_v61, 0.0  ;;  %v677_v3 = vpack.c.bf16 %v645_v62, %v643_v1 }
 0x16d   :  { %v678_v2 = vpack.c.bf16 %v646_v0, %v644_v63 }
 0x16f   :  { %1421 = vmatprep.mubr.msk.bf16.mxu1 %vm805_vm3, %v678_v2 }
 0x170   :  { %1044 = vmatmul.mubr.bf16.gmra.mxu1 %v677_v3 }
 0x1b8   :  { %v895_v18 = vpop.f32.mrf.mxu1 }
 0x1b9   :  { %v896_v7 = vadd.f32 %v895_v18, %v1944_v5 }
 0x1ba   :  { %v897_v17 = vpop.f32.mrf.mxu1 }
 0x1bb   :  { %v898_v9 = vadd.f32 %v897_v17, %v1947_v6  ;;  %v1054_v16 = vmax.f32 %v896_v7, 0.0 }
 0x1bc   :  { %v899_v8 = vpop.f32.mrf.mxu1 }
 0x1bd   :  { %v900_v10 = vadd.f32 %v899_v8, %v1944_v5  ;;  %v1055_v22 = vmax.f32 %v898_v9, 0.0 }
 0x1be   :  { %v901_v15 = vpop.f32.mrf.mxu1 }
 0x1bf   :  { %v1056_v19 = vmax.f32 %v900_v10, 0.0  ;;  %v902_v20 = vadd.f32 %v901_v15, %v1947_v6 }
 0x1c0   :  { %v905_v21 = vpop.f32.mrf.mxu1 }
 0x1c1   :  { %v1953_v23 = vpack.c.bf16 %v1056_v19, %v1054_v16  ;;  %v1057_v24 = vmax.f32 %v902_v20, 0.0  ;;  %v906_v27 = vadd.f32 %v905_v21, %v1944_v5  ;;  %v1571_v19 = vmov 1966171168  }
 0x1c2   :  { %v907_v25 = vpop.f32.mrf.mxu1  ;;  %v1162_v20 = vunpack.c.l.s4 %v1571_v19 }
 0x1c3   :  { %v1955_v26 = vpack.c.bf16 %v1057_v24, %v1055_v22  ;;  %v908_v29 = vadd.f32 %v907_v25, %v1947_v6  ;;  %v1058_v32 = vmax.f32 %v906_v27, 0.0 }
 0x1c4   :  { %v909_v28 = vpop.f32.mrf.mxu1 }
 0x1c5   :  { %v910_v30 = vadd.f32 %v909_v28, %v1944_v5  ;;  %v1059_v36 = vmax.f32 %v908_v29, 0.0  ;;  %v1998_v28 = vld.sshfl [vmem:[%s2132_s6] sm:$0x11 pattern:$0x75316420]  ;;  %v1163_v29 = vunpack.c.0.s8 %v1162_v20 }
 0x1c6   :  { %v911_v31 = vpop.f32.mrf.mxu1 }
 0x1c7   :  { %v1060_v33 = vmax.f32 %v910_v30, 0.0  ;;  %v912_v34 = vadd.f32 %v911_v31, %v1947_v6 }
 0x1c8   :  { %v915_v35 = vpop.f32.mrf.mxu1 }
 0x1c9   :  { %v1961_v37 = vpack.c.bf16 %v1060_v33, %v1058_v32  ;;  %v1061_v38 = vmax.f32 %v912_v34, 0.0  ;;  %v916_v41 = vadd.f32 %v915_v35, %v1944_v5  ;;  %v1160_v32 = vcombine.high %v1998_v28, %v1998_v28 }
 0x1ca   :  { %v917_v39 = vpop.f32.mrf.mxu1  ;;  %v2005_v35 = vsub.s32 %v1163_v29, %v1843_v12 }
 0x1cb   :  { %v1963_v40 = vpack.c.bf16 %v1061_v38, %v1059_v36  ;;  %v918_v43 = vadd.f32 %v917_v39, %v1947_v6  ;;  %v1062_v46 = vmax.f32 %v916_v41, 0.0 }
 0x1cc   :  { %v919_v42 = vpop.f32.mrf.mxu1 }
 0x1cd   :  { %v920_v44 = vadd.f32 %v919_v42, %v1944_v5  ;;  %v1063_v50 = vmax.f32 %v918_v43, 0.0  ;;  %v1174_v43 = vrot.slane %v1160_v32, %v2005_v35 }
 0x1ce   :  { %v921_v45 = vpop.f32.mrf.mxu1 }
 0x1cf   :  { %v1064_v47 = vmax.f32 %v920_v44, 0.0  ;;  %v922_v48 = vadd.f32 %v921_v45, %v1947_v6  ;;  %1439 = vmatprep.mubr.msk.bf16.mxu0 %vm805_vm3, %v1174_v43 }
 0x1d0   :  { %v925_v49 = vpop.f32.mrf.mxu1 }
 0x1d1   :  { %v1969_v51 = vpack.c.bf16 %v1064_v47, %v1062_v46  ;;  %v1065_v52 = vmax.f32 %v922_v48, 0.0  ;;  %v926_v55 = vadd.f32 %v925_v49, %v1944_v5 }
 0x1d2   :  { %v1971_v53 = vpop.f32.mrf.mxu1 }
 0x1d3   :  { %v1973_v54 = vpack.c.bf16 %v1065_v52, %v1063_v50  ;;  %v1066_v59 = vmax.f32 %v926_v55, 0.0 }
 0x1d4   :  { %v929_v56 = vpop.f32.mrf.mxu1 }
 0x1d5   :  { %v930_v57 = vadd.f32 %v929_v56, %v1944_v5 }
 0x1d6   :  { %v1977_v58 = vpop.f32.mrf.mxu1 }
 0x1d7   :  { %v1068_v60 = vmax.f32 %v930_v57, 0.0 }
 0x1d8   :  { %v1979_v61 = vpop.f32.mrf.mxu1 }
 0x1d9   :  { %v1981_v62 = vpack.c.bf16 %v1068_v60, %v1066_v59 }
 0x1da   :  { %v1983_v63 = vpop.f32.mrf.mxu1 }
 0x1dc   :  { %v1985_v0 = vpop.f32.mrf.mxu1 }
 0x1de   :  { %v1987_v1 = vpop.f32.mrf.mxu1 }
 0x1df   :  { %v942_v29 = vadd.f32 %v1987_v1, %v1947_v6 }
 0x1e0   :  { %v1989_v2 = vpop.f32.mrf.mxu1 }
 0x1e2   :  { %v947_v3 = vpop.f32.mrf.mxu1 }
 0x1e3   :  { %v948_v59 = vadd.f32 %v947_v3, %v1947_v6 }
 0x1e4   :  { %v949_v4 = vpop.f32.mrf.mxu1 }
 0x1e6   :  { %v951_v18 = vpop.f32.mrf.mxu1 }
 0x1e7   :  { %v952_v12 = vadd.f32 %v951_v18, %v1947_v6 }
 0x1e8   :  { %v955_v17 = vpop.f32.mrf.mxu1 }
 0x1e9   :  { %v956_v56 = vadd.f32 %v955_v17, %v1944_v5  ;;  %v1075_v17 = vmax.f32 %v948_v59, 0.0  ;;  %v936_v59 = vadd.f32 %v1979_v61, %v1944_v5 }
 0x1ea   :  { %v957_v7 = vpop.f32.mrf.mxu1 }
 0x1eb   :  { %v958_v30 = vadd.f32 %v957_v7, %v1947_v6  ;;  %v1078_v20 = vmax.f32 %v956_v56, 0.0 }
 0x1ec   :  { %v959_v8 = vpop.f32.mrf.mxu1 }
 0x1ed   :  { %v1079_v44 = vmax.f32 %v958_v30, 0.0  ;;  %v960_v47 = vadd.f32 %v959_v8, %v1944_v5 }
 0x1ee   :  { %v961_v9 = vpop.f32.mrf.mxu1 }
 0x1ef   :  { %v962_v21 = vadd.f32 %v961_v9, %v1947_v6  ;;  %v1080_v18 = vmax.f32 %v960_v47, 0.0 }
 0x1f0   :  { %v965_v10 = vpop.f32.mrf.mxu1 }
 0x1f1   :  { %v966_v25 = vadd.f32 %v965_v10, %v1944_v5  ;;  %v1081_v36 = vmax.f32 %v962_v21, 0.0  ;;  %v1077_v10 = vmax.f32 %v952_v12, 0.0 }
 0x1f2   :  { %v967_v15 = vpop.f32.mrf.mxu1 }
 0x1f3   :  { %v968_v22 = vadd.f32 %v967_v15, %v1947_v6  ;;  %v1082_v41 = vmax.f32 %v966_v25, 0.0  ;;  %v1131_v50 = vpack.c.bf16 %v1081_v36, %v1079_v44  ;;  %v1130_v25 = vpack.c.bf16 %v1080_v18, %v1078_v20 }
 0x1f4   :  { %v969_v16 = vpop.f32.mrf.mxu1  ;;  %v1129_v30 = vpack.c.bf16 %v1077_v10, %v1075_v17  ;;  %v938_v36 = vadd.f32 %v1983_v63, %v1947_v6 }
 0x1f5   :  { %v970_v24 = vadd.f32 %v969_v16, %v1944_v5  ;;  %v1083_v38 = vmax.f32 %v968_v22, 0.0 }
 0x1f6   :  { %v971_v27 = vpop.f32.mrf.mxu1  ;;  %v1071_v47 = vmax.f32 %v938_v36, 0.0 }
 0x1f7   :  { %v972_v31 = vadd.f32 %v971_v27, %v1947_v6  ;;  %v1084_v33 = vmax.f32 %v970_v24, 0.0  ;;  %v950_v24 = vadd.f32 %v949_v4, %v1944_v5 }
 0x1f8   :  { %v975_v34 = vpop.f32.mrf.mxu1 }
 0x1f9   :  { %v1085_v39 = vmax.f32 %v972_v31, 0.0  ;;  %v976_v46 = vadd.f32 %v975_v34, %v1944_v5  ;;  %v1132_v48 = vpack.c.bf16 %v1084_v33, %v1082_v41  ;;  %v946_v33 = vadd.f32 %v1989_v2, %v1944_v5 }
 0x1fa   :  { %v977_v42 = vpop.f32.mrf.mxu1  ;;  %v1076_v1 = vmax.f32 %v950_v24, 0.0 }
 0x1fb   :  { %v1133_v45 = vpack.c.bf16 %v1085_v39, %v1083_v38  ;;  %v978_v52 = vadd.f32 %v977_v42, %v1947_v6  ;;  %v1086_v60 = vmax.f32 %v976_v46, 0.0  ;;  %v1073_v42 = vmax.f32 %v942_v29, 0.0 }
 0x1fc   :  { %v979_v49 = vpop.f32.mrf.mxu1  ;;  %v1074_v46 = vmax.f32 %v946_v33, 0.0 }
 0x1fd   :  { %v980_v55 = vadd.f32 %v979_v49, %v1944_v5  ;;  %1423 = vmatprep.subr.msk.bf16.mxu0 %vm805_vm3, %v1133_v45  ;;  %v1087_v15 = vmax.f32 %v978_v52, 0.0  ;;  %v940_v49 = vadd.f32 %v1985_v0, %v1944_v5  ;;  %v932_v52 = vadd.f32 %v1977_v58, %v1947_v6 }
 0x1fe   :  { %v981_v57 = vpop.f32.mrf.mxu1  ;;  %1239 = vmatpush1.bf16.xpose.msra.mxu0 %v1132_v48  ;;  %v1128_v12 = vpack.c.bf16 %v1076_v1, %v1074_v46 }
 0x1ff   :  { %v1088_v7 = vmax.f32 %v980_v55, 0.0  ;;  %v982_v8 = vadd.f32 %v981_v57, %v1947_v6  ;;  %1424 = vmatprep.subr.msk.bf16.mxu0 %vm805_vm3, %v1131_v50  ;;  %v1127_v55 = vpack.c.bf16 %v1073_v42, %v1071_v47  ;;  %v1072_v58 = vmax.f32 %v940_v49, 0.0 }
 0x200   :  { %v985_v9 = vpop.f32.mrf.mxu1  ;;  %v1069_v10 = vmax.f32 %v932_v52, 0.0 }
 0x201   :  { %v2019_v16 = vpack.c.bf16 %v1088_v7, %v1086_v60  ;;  %v1089_v19 = vmax.f32 %v982_v8, 0.0  ;;  %v986_v3 = vadd.f32 %v985_v9, %v1944_v5  ;;  %v928_v7 = vadd.f32 %v1971_v53, %v1947_v6 }
 0x202   :  { %v987_v21 = vpop.f32.mrf.mxu1 }
 0x203   :  { %v2021_v22 = vpack.c.bf16 %v1089_v19, %v1087_v15  ;;  %v988_v31 = vadd.f32 %v987_v21, %v1947_v6  ;;  %v1090_v38 = vmax.f32 %v986_v3, 0.0  ;;  %v1070_v21 = vmax.f32 %v936_v59, 0.0 }
 0x204   :  { %v989_v27 = vpop.f32.mrf.mxu1  ;;  %v1067_v17 = vmax.f32 %v928_v7, 0.0 }
 0x205   :  { %v990_v32 = vadd.f32 %v989_v27, %v1944_v5  ;;  %v1091_v43 = vmax.f32 %v988_v31, 0.0  ;;  %v1126_v24 = vpack.c.bf16 %v1072_v58, %v1070_v21 }
 0x206   :  { %v991_v34 = vpop.f32.mrf.mxu1  ;;  %1241 = vmatpush1.bf16.xpose.msra.mxu0 %v1130_v25  ;;  %v1125_v27 = vpack.c.bf16 %v1069_v10, %v1067_v17 }
 0x207   :  { %v1092_v4 = vmax.f32 %v990_v32, 0.0  ;;  %v992_v39 = vadd.f32 %v991_v34, %v1947_v6  ;;  %1425 = vmatprep.subr.msk.bf16.mxu0 %vm805_vm3, %v1129_v30 }
 0x208   :  { %v995_v41 = vpop.f32.mrf.mxu1 }
 0x209   :  { %v2035_v44 = vpack.c.bf16 %v1092_v4, %v1090_v38  ;;  %v1093_v45 = vmax.f32 %v992_v39, 0.0  ;;  %v996_v63 = vadd.f32 %v995_v41, %v1944_v5 }
 0x20a   :  { %v997_v2 = vpop.f32.mrf.mxu1 }
 0x20b   :  { %v2037_v48 = vpack.c.bf16 %v1093_v45, %v1091_v43  ;;  %v998_v56 = vadd.f32 %v997_v2, %v1947_v6  ;;  %v1094_v8 = vmax.f32 %v996_v63, 0.0 }
 0x20c   :  { %v999_v50 = vpop.f32.mrf.mxu1 }
 0x20d   :  { %v1000_v57 = vadd.f32 %v999_v50, %v1944_v5  ;;  %v1095_v15 = vmax.f32 %v998_v56, 0.0 }
 0x20e   :  { %v1001_v60 = vpop.f32.mrf.mxu1  ;;  %1243 = vmatpush1.bf16.xpose.msra.mxu0 %v1128_v12 }
 0x20f   :  { %v1096_v0 = vmax.f32 %v1000_v57, 0.0  ;;  %v1002_v18 = vadd.f32 %v1001_v60, %v1947_v6  ;;  %1426 = vmatprep.subr.msk.bf16.mxu0 %vm805_vm3, %v1127_v55 }
 0x210   :  { %v1005_v9 = vpop.f32.mrf.mxu1 }
 0x211   :  { %v2052_v19 = vpack.c.bf16 %v1096_v0, %v1094_v8  ;;  %v1097_v20 = vmax.f32 %v1002_v18, 0.0  ;;  %v1006_v53 = vadd.f32 %v1005_v9, %v1944_v5 }
 0x212   :  { %v2054_v61 = vpop.f32.mrf.mxu1 }
 0x213   :  { %v2056_v3 = vpack.c.bf16 %v1097_v20, %v1095_v15  ;;  %v1098_v31 = vmax.f32 %v1006_v53, 0.0 }
 0x214   :  { %v1009_v25 = vpop.f32.mrf.mxu1 }
 0x215   :  { %v1010_v29 = vadd.f32 %v1009_v25, %v1944_v5 }
 0x216   :  { %v2060_v30 = vpop.f32.mrf.mxu1  ;;  %1245 = vmatpush1.bf16.xpose.msra.mxu0 %v1126_v24 }
 0x217   :  { %v1100_v32 = vmax.f32 %v1010_v29, 0.0  ;;  %1427 = vmatprep.subr.msk.bf16.mxu0 %vm805_vm3, %v1125_v27 }
 0x218   :  { %v2063_v33 = vpop.f32.mrf.mxu1 }
 0x219   :  { %v2065_v34 = vpack.c.bf16 %v1100_v32, %v1098_v31 }
 0x21a   :  { %v1017_v36 = vpop.f32.mrf.mxu1 }
 0x21b   :  { %v1018_v27 = vadd.f32 %v1017_v36, %v1947_v6  ;;  %v1008_v36 = vadd.f32 %v2054_v61, %v1947_v6 }
 0x21c   :  { %v1019_v38 = vpop.f32.mrf.mxu1 }
 0x21e   :  { %v1021_v4 = vpop.f32.mrf.mxu1  ;;  %1247 = vmatpush1.bf16.xpose.msra.mxu0 %v1981_v62 }
 0x21f   :  { %1428 = vmatprep.subr.msk.bf16.mxu0 %vm805_vm3, %v1973_v54  ;;  %v1022_v53 = vadd.f32 %v1021_v4, %v1947_v6  ;;  %v1016_v4 = vadd.f32 %v2063_v33, %v1944_v5 }
 0x220   :  { %v1025_v39 = vpop.f32.mrf.mxu1 }
 0x221   :  { %v1026_v25 = vadd.f32 %v1025_v39, %v1944_v5  ;;  %v1105_v31 = vmax.f32 %v1022_v53, 0.0 }
 0x222   :  { %v1027_v1 = vpop.f32.mrf.mxu1 }
 0x223   :  { %v1028_v58 = vadd.f32 %v1027_v1, %v1947_v6  ;;  %v1106_v32 = vmax.f32 %v1026_v25, 0.0  ;;  %v1103_v1 = vmax.f32 %v1018_v27, 0.0 }
 0x224   :  { %v1029_v41 = vpop.f32.mrf.mxu1 }
 0x225   :  { %v1107_v20 = vmax.f32 %v1028_v58, 0.0  ;;  %v1030_v21 = vadd.f32 %v1029_v41, %v1944_v5  ;;  %v1012_v41 = vadd.f32 %v2060_v30, %v1947_v6 }
 0x226   :  { %v1031_v42 = vpop.f32.mrf.mxu1  ;;  %1249 = vmatpush1.bf16.xpose.msra.mxu0 %v1969_v51 }
 0x227   :  { %1429 = vmatprep.subr.msk.bf16.mxu0 %vm805_vm3, %v1963_v40  ;;  %v1032_v0 = vadd.f32 %v1031_v42, %v1947_v6  ;;  %v1108_v29 = vmax.f32 %v1030_v21, 0.0  ;;  %v1020_v42 = vadd.f32 %v1019_v38, %v1944_v5 }
 0x228   :  { %v1035_v43 = vpop.f32.mrf.mxu1 }
 0x229   :  { %v1109_v10 = vmax.f32 %v1032_v0, 0.0  ;;  %v1104_v39 = vmax.f32 %v1020_v42, 0.0 }
 0x22a   :  { %v1037_v45 = vpop.f32.mrf.mxu1 }
 0x22b   :  { %v1038_v50 = vadd.f32 %v1037_v45, %v1947_v6  ;;  %v1145_v24 = vpack.c.bf16 %v1109_v10, %v1107_v20  ;;  %v1143_v45 = vpack.c.bf16 %v1105_v31, %v1103_v1 }
 0x22c   :  { %v1039_v46 = vpop.f32.mrf.mxu1 }
 0x22d   :  { %v1111_v59 = vmax.f32 %v1038_v50, 0.0  ;;  %v1040_v7 = vadd.f32 %v1039_v46, %v1944_v5  ;;  %v1101_v46 = vmax.f32 %v1012_v41, 0.0 }
 0x22e   :  { %v1041_v2 = vpop.f32.mrf.mxu1  ;;  %1251 = vmatpush1.bf16.xpose.msra.mxu0 %v1961_v37 }
 0x22f   :  { %1430 = vmatprep.subr.msk.bf16.mxu0 %vm805_vm3, %v1955_v26  ;;  %v1042_v63 = vadd.f32 %v1041_v2, %v1947_v6  ;;  %v1112_v9 = vmax.f32 %v1040_v7, 0.0  ;;  %v1102_v2 = vmax.f32 %v1016_v4, 0.0 }
 0x230   :  { %v1045_v62 = vpop.f32.mrf.mxu1 }
 0x231   :  { %v1046_v40 = vadd.f32 %v1045_v62, %v1944_v5  ;;  %v1113_v26 = vmax.f32 %v1042_v63, 0.0  ;;  %v1099_v62 = vmax.f32 %v1008_v36, 0.0 }
 0x232   :  { %v1047_v54 = vpop.f32.mrf.mxu1 }
 0x233   :  { %v1048_v49 = vadd.f32 %v1047_v54, %v1947_v6  ;;  %v1114_v57 = vmax.f32 %v1046_v40, 0.0  ;;  %v1147_v18 = vpack.c.bf16 %v1113_v26, %v1111_v59  ;;  %v1142_v54 = vpack.c.bf16 %v1104_v39, %v1102_v2 }
 0x234   :  { %v1049_v47 = vpop.f32.mrf.mxu1  ;;  %v1141_v38 = vpack.c.bf16 %v1101_v46, %v1099_v62 }
 0x235   :  { %v1050_v51 = vadd.f32 %v1049_v47, %v1944_v5  ;;  %v1115_v55 = vmax.f32 %v1048_v49, 0.0 }
 0x236   :  { %v1051_v12 = vpop.f32.mrf.mxu1  ;;  %1253 = vmatpush1.bf16.xpose.msra.mxu0 %v1953_v23  ;;  %v1036_v23 = vadd.f32 %v1035_v43, %v1944_v5  ;;  %v1144_v43 = vpack.c.bf16 %v1108_v29, %v1106_v32  ;;  %v1167_v5 = vrot.slane %v1998_v28, %v2005_v35 }
 0x237   :  { %v1052_v37 = vadd.f32 %v1051_v12, %v1947_v6  ;;  %v1116_v52 = vmax.f32 %v1050_v51, 0.0  ;;  %v1151_v6 = vld [vmem:[%s2127_s1] sm:$0x3]  ;;  %s1549_s1 = scalar_lea.vmem %s1309_s2, 32 }
 0x238   :  { %v1110_v15 = vmax.f32 %v1036_v23, 0.0  ;;  %v1184_v61 = vrot.slane %v1151_v6, %v1846_v13  ;;  %p1550_p0 = scmp.ne.s32.totalorder %s1309_s2, %s1549_s1  ;;  %p1555_p2 = scmp.lt.s32.totalorder %s1549_s1, %s1549_s1 }
 0x239   :  { %v1117_v56 = vmax.f32 %v1052_v37, 0.0  ;;  %v1148_v8 = vpack.c.bf16 %v1116_v52, %v1114_v57 }
 0x23a   :  { %v1146_v17 = vpack.c.bf16 %v1112_v9, %v1110_v15  ;;  %p1556_p3 = por %p1555_p2, %p1554_p1 }
 0x23b   :  { %v1149_v60 = vpack.c.bf16 %v1117_v56, %v1115_v55 }
 0x23c   :  { %p1557_p4 = pnand %p1556_p3, %p1550_p0 }
 0x23d   :  { %1431 = vmatprep.subr.msk.bf16.mxu0 %vm805_vm3, %v1149_v60 }
 0x23e   :  { %1255 = vmatpush2.bf16.xpose.msra.mxu0 %v1148_v8 }
 0x23f   :  { %1432 = vmatprep.subr.msk.bf16.mxu0 %vm805_vm3, %v1147_v18 }
 0x246   :  { %1257 = vmatpush2.bf16.xpose.msra.mxu0 %v1146_v17 }
 0x247   :  { %1433 = vmatprep.subr.msk.bf16.mxu0 %vm805_vm3, %v1145_v24 }
 0x24e   :  { %1259 = vmatpush2.bf16.xpose.msra.mxu0 %v1144_v43 }
 0x24f   :  { %1434 = vmatprep.subr.msk.bf16.mxu0 %vm805_vm3, %v1143_v45 }
 0x256   :  { %1261 = vmatpush2.bf16.xpose.msra.mxu0 %v1142_v54 }
 0x257   :  { %1435 = vmatprep.subr.msk.bf16.mxu0 %vm805_vm3, %v1141_v38 }
 0x25e   :  { %1263 = vmatpush2.bf16.xpose.msra.mxu0 %v2065_v34 }
 0x25f   :  { %1436 = vmatprep.subr.msk.bf16.mxu0 %vm805_vm3, %v2056_v3 }
 0x266   :  { %1265 = vmatpush2.bf16.xpose.msra.mxu0 %v2052_v19  ;;  %v1180_v19 = vrot.slane %v1151_v6, %v1849_v14 }
 0x267   :  { %1437 = vmatprep.subr.msk.bf16.mxu0 %vm805_vm3, %v2037_v48 }
 0x26e   :  { %1267 = vmatpush2.bf16.xpose.msra.mxu0 %v2035_v44 }
 0x26f   :  { %1438 = vmatprep.subr.msk.bf16.mxu0 %vm805_vm3, %v2021_v22 }
 0x276   :  { %1269 = vmatpush2.bf16.xpose.msra.mxu0 %v2019_v16 }
 0x27d   :  { %1271 = vmatmul.mubr.bf16.vlgmr.msra.gmra.mxu0 %v1167_v5 }
 0x33d   :  { %v1272_v48 = vpop.f32.mrf.mxu0 }
 0x33e   :  { %v1273_v44 = vadd.f32 %v1272_v48, %v1180_v19 }
 0x33f   :  { %v1274_v3 = vpop.f32.mrf.mxu0 }
 0x340   :  { %v1275_v30 = vadd.f32 %v1274_v3, %v1184_v61 }
 0x341   :  { %v1276_v33 = vpop.f32.mrf.mxu0 }
 0x342   :  { %v1281_v22 = vcombine.low %v1273_v44, %v1275_v30 }
 0x343   :  { %v1277_v34 = vpop.f32.mrf.mxu0 }
 0x344   :  { %v1288_v28 = vrot.slane %v1281_v22, %v2005_v35 }
 0x346   :  { %v1295_v16 = vrot.slane %v1288_v28, %v2005_v35 }
 0x348   :  { %1301 = vst.msk [vmem:[#allocation2] sm:$0x3] %vm1299_vm4, %v1295_v16 }
 0x349   :  { %1560 = shalt.err (!%p1557_p4)
}
 0x34a   :  { %1311 = dma.vmem_to_hbm [thread:$0]  %s1309_s2, 32, %s2133_s7, [#allocation3]  }
 0x34b   :  { %1569 = dma.done.wait [#allocation3], 32  }
 0x34c   :  { %1570 = vsyncadd [#allocation3], 4294967264 }
 0x34d   :  { %1315 = vsyncpa [#allocation3], 1 }

</bundles_post_ra>
